<compile_context>
chip_gen: v5e
topology: v5e:2x2
jax: 0.10.0
libtpu: 0.0.40
codegen_flags: <defaults>
</compile_context>

<pallas_src>
import jax
import jax.numpy as jnp
from jax.experimental import pallas as pl
from jax.experimental.pallas import tpu as pltpu


def _round_up(n, m):
    return ((n + m - 1) // m) * m


def _xlstm_cell_kernel(x_ref,        # (bm, Dx_pad)
                       h_prev_ref,   # (bm, H_pad)
                       c_prev_ref,   # (bm, H_pad)
                       wx_ref,       # (Dx_pad, 4*H_pad)
                       wh_ref,       # (H_pad,  4*H_pad)
                       b_ref,        # (1,      4*H_pad)
                       h_out_ref,    # (bm, H_pad)
                       c_out_ref):   # (bm, H_pad)
    H = c_prev_ref.shape[-1]  # padded hidden size (static)

    # Single fused gate projection, f32 accumulation on the MXU.
    z = (jnp.dot(x_ref[...], wx_ref[...], preferred_element_type=jnp.float32)
         + jnp.dot(h_prev_ref[...], wh_ref[...],
                   preferred_element_type=jnp.float32)
         + b_ref[...].astype(jnp.float32))

    # Fused lane layout is [ i | f | o | c~ ]:
    #   one contiguous sigmoid slab (3H lanes) + one tanh slab (H lanes).
    gates = jax.nn.sigmoid(z[:, :3 * H])
    c_tilda = jnp.tanh(z[:, 3 * H:])

    i_t = gates[:, 0 * H:1 * H]
    f_t = gates[:, 1 * H:2 * H]
    o_t = gates[:, 2 * H:3 * H]

    c_prev = c_prev_ref[...].astype(jnp.float32)
    c_t = f_t * c_prev + i_t * c_tilda
    h_t = o_t * jnp.tanh(c_t)

    h_out_ref[...] = h_t.astype(h_out_ref.dtype)
    c_out_ref[...] = c_t.astype(c_out_ref.dtype)


def prepare_fused_params(params, input_size, hidden_size, dtype=jnp.float32):
    """One-time parameter fusion. Call ONCE at init, not per forward step.

    Converts PyTorch-convention per-gate Linear weights
        W_* : (H, input_size + H),  b_* : (H,)
    into the fused, pre-transposed, zero-padded layout the kernel consumes:
        wx : (Dx_pad, 4*H_pad),  wh : (H_pad, 4*H_pad),  b : (1, 4*H_pad)
    with H padded to a multiple of 32 (so the fused lane axis 4*H_pad is a
    multiple of 128) and row dims padded to multiples of 8.
    """
    H, Hp = hidden_size, _round_up(hidden_size, 32)
    Dx, Dxp = input_size, _round_up(input_size, 8)

    def gate_blocks(name):
        w = params[f"W_{name}"].astype(dtype)          # (H, Dx + H)
        b = params[f"b_{name}"].astype(dtype)          # (H,)
        wx = jnp.zeros((Dxp, Hp), dtype).at[:Dx, :H].set(w[:, :Dx].T)
        wh = jnp.zeros((Hp, Hp), dtype).at[:H, :H].set(w[:, Dx:].T)
        bp = jnp.zeros((Hp,), dtype).at[:H].set(b)
        return wx, wh, bp

    blocks = [gate_blocks(n) for n in ("i", "f", "o", "c")]
    wx = jnp.concatenate([blk[0] for blk in blocks], axis=1)   # (Dxp, 4*Hp)
    wh = jnp.concatenate([blk[1] for blk in blocks], axis=1)   # (Hp, 4*Hp)
    b = jnp.concatenate([blk[2] for blk in blocks], axis=0).reshape(1, 4 * Hp)
    return wx, wh, b


@jax.jit
def xlstm_cell_forward(x, h_prev, c_prev, wx, wh, b):
    """Pallas-fused equivalent of xLSTMCell.forward.

    x:      (B, input_size)   h_prev/c_prev: (B, hidden_size)
    wx/wh/b: output of prepare_fused_params.
    Returns (h_t, c_t), each (B, hidden_size).
    """
    B, _ = x.shape
    H = h_prev.shape[1]
    Dxp = wx.shape[0]
    Hp = wh.shape[0]

    # Batch tile: multiple of 8 sublanes, capped to keep per-step VMEM modest;
    # pad B up to a whole number of tiles.
    bm = min(512, _round_up(B, 8))
    Bp = _round_up(B, bm)

    def pad2(a, rows, cols):
        return jnp.pad(a, ((0, rows - a.shape[0]), (0, cols - a.shape[1])))

    xp = pad2(x, Bp, Dxp)
    hp = pad2(h_prev, Bp, Hp)
    cp = pad2(c_prev, Bp, Hp)

    batch_spec_x = pl.BlockSpec((bm, Dxp), lambda i: (i, 0))
    batch_spec_h = pl.BlockSpec((bm, Hp), lambda i: (i, 0))

    def whole(shape):
        return pl.BlockSpec(shape, lambda i: (0, 0))

    h_t, c_t = pl.pallas_call(
        _xlstm_cell_kernel,
        out_shape=(jax.ShapeDtypeStruct((Bp, Hp), x.dtype),
                   jax.ShapeDtypeStruct((Bp, Hp), x.dtype)),
        grid=(Bp // bm,),
        in_specs=[batch_spec_x, batch_spec_h, batch_spec_h,
                  whole((Dxp, 4 * Hp)), whole((Hp, 4 * Hp)),
                  whole((1, 4 * Hp))],
        out_specs=(batch_spec_h, batch_spec_h),
        compiler_params=pltpu.CompilerParams(
            dimension_semantics=("parallel",)),
    )(xp, hp, cp, wx, wh, b)

    return h_t[:B, :H], c_t[:B, :H]


def _reference_forward(x, h_prev, c_prev, params):
    combined = jnp.concatenate([x, h_prev], axis=1)
    lin = lambda w, bb: combined @ w.T + bb
    i_t = jax.nn.sigmoid(lin(params["W_i"], params["b_i"]))
    f_t = jax.nn.sigmoid(lin(params["W_f"], params["b_f"]))
    o_t = jax.nn.sigmoid(lin(params["W_o"], params["b_o"]))
    c_tilda = jnp.tanh(lin(params["W_c"], params["b_c"]))
    c_t = f_t * c_prev + i_t * c_tilda
    h_t = o_t * jnp.tanh(c_t)
    return h_t, c_t


if __name__ == "__main__":
    input_size = 16
    hidden_size = 32
    batch = 8
    D = input_size + hidden_size

    key = jax.random.PRNGKey(0)
    keys = jax.random.split(key, 11)

    # Deterministic synthetic parameters (PyTorch nn.Linear convention shapes).
    scale = 1.0 / jnp.sqrt(jnp.float32(D))
    params = {
        "W_i": jax.random.uniform(keys[0], (hidden_size, D), jnp.float32, -scale, scale),
        "b_i": jax.random.uniform(keys[1], (hidden_size,), jnp.float32, -scale, scale),
        "W_f": jax.random.uniform(keys[2], (hidden_size, D), jnp.float32, -scale, scale),
        "b_f": jax.random.uniform(keys[3], (hidden_size,), jnp.float32, -scale, scale),
        "W_o": jax.random.uniform(keys[4], (hidden_size, D), jnp.float32, -scale, scale),
        "b_o": jax.random.uniform(keys[5], (hidden_size,), jnp.float32, -scale, scale),
        "W_c": jax.random.uniform(keys[6], (hidden_size, D), jnp.float32, -scale, scale),
        "b_c": jax.random.uniform(keys[7], (hidden_size,), jnp.float32, -scale, scale),
    }

    x = jax.random.normal(keys[8], (batch, input_size), jnp.float32)
    h_prev = jax.random.normal(keys[9], (batch, hidden_size), jnp.float32)
    c_prev = jax.random.normal(keys[10], (batch, hidden_size), jnp.float32)

    # One-time fusion of the four gate Linears into a single (D, 4H) projection.
    wx, wh, b = prepare_fused_params(params, input_size, hidden_size)

    h_t, c_t = xlstm_cell_forward(x, h_prev, c_prev, wx, wh, b)
    jax.block_until_ready((h_t, c_t))

    h_ref, c_ref = _reference_forward(x, h_prev, c_prev, params)
    assert jnp.allclose(h_t, h_ref, atol=1e-5, rtol=1e-5)
    assert jnp.allclose(c_t, c_ref, atol=1e-5, rtol=1e-5)

    print("KERNEL_OK")
</pallas_src>

<mosaic_0001>
module attributes {stable_mosaic.version = 11 : i64} {
  func.func @_xlstm_cell_kernel(%arg0: i32, %arg1: memref<8x16xf32, #tpu.memory_space<vmem>>, %arg2: memref<8x32xf32, #tpu.memory_space<vmem>>, %arg3: memref<8x32xf32, #tpu.memory_space<vmem>>, %arg4: memref<16x128xf32, #tpu.memory_space<vmem>>, %arg5: memref<32x128xf32, #tpu.memory_space<vmem>>, %arg6: memref<1x128xf32, #tpu.memory_space<vmem>>, %arg7: memref<8x32xf32, #tpu.memory_space<vmem>>, %arg8: memref<8x32xf32, #tpu.memory_space<vmem>>) attributes {dimension_semantics = [#tpu.dimension_semantics<parallel>], iteration_bounds = array<i64: 1>, scalar_prefetch = 0 : i64, scratch_operands = 0 : i64, tpu.core_type = #tpu.core_type<tc>, window_params = [{transform_indices = @transform_0, window_bounds = array<i64: 8, 16>}, {transform_indices = @transform_1, window_bounds = array<i64: 8, 32>}, {transform_indices = @transform_2, window_bounds = array<i64: 8, 32>}, {pipeline_mode = #tpu.pipeline_mode<synchronous>, transform_indices = @transform_3, window_bounds = array<i64: 16, 128>}, {pipeline_mode = #tpu.pipeline_mode<synchronous>, transform_indices = @transform_4, window_bounds = array<i64: 32, 128>}, {pipeline_mode = #tpu.pipeline_mode<synchronous>, transform_indices = @transform_5, window_bounds = array<i64: 1, 128>}, {transform_indices = @transform_6, window_bounds = array<i64: 8, 32>}, {transform_indices = @transform_7, window_bounds = array<i64: 8, 32>}]} {
    %c0 = arith.constant 0 : index
    %c0_0 = arith.constant 0 : index
    %0 = vector.load %arg1[%c0, %c0_0] : memref<8x16xf32, #tpu.memory_space<vmem>>, vector<8x16xf32>
    %c0_1 = arith.constant 0 : index
    %c0_2 = arith.constant 0 : index
    %1 = vector.load %arg4[%c0_1, %c0_2] : memref<16x128xf32, #tpu.memory_space<vmem>>, vector<16x128xf32>
    %cst = arith.constant dense<0.000000e+00> : vector<8x128xf32>
    %2 = tpu.matmul %0, %1, %cst {dimension_numbers = #tpu.dot_dimension_numbers<[1], [0], [0], [1], [0, 0, 1, 1], [], []>} : vector<8x16xf32>, vector<16x128xf32>, vector<8x128xf32> -> vector<8x128xf32>
    %c0_3 = arith.constant 0 : index
    %c0_4 = arith.constant 0 : index
    %3 = vector.load %arg2[%c0_3, %c0_4] : memref<8x32xf32, #tpu.memory_space<vmem>>, vector<8x32xf32>
    %c0_5 = arith.constant 0 : index
    %c0_6 = arith.constant 0 : index
    %4 = vector.load %arg5[%c0_5, %c0_6] : memref<32x128xf32, #tpu.memory_space<vmem>>, vector<32x128xf32>
    %cst_7 = arith.constant dense<0.000000e+00> : vector<8x128xf32>
    %5 = tpu.matmul %3, %4, %cst_7 {dimension_numbers = #tpu.dot_dimension_numbers<[1], [0], [0], [1], [0, 0, 1, 1], [], []>} : vector<8x32xf32>, vector<32x128xf32>, vector<8x128xf32> -> vector<8x128xf32>
    %6 = arith.addf %2, %5 : vector<8x128xf32>
    %c0_8 = arith.constant 0 : index
    %c0_9 = arith.constant 0 : index
    %7 = vector.load %arg6[%c0_8, %c0_9] : memref<1x128xf32, #tpu.memory_space<vmem>>, vector<1x128xf32>
    %8 = vector.broadcast %7 : vector<1x128xf32> to vector<8x128xf32>
    %9 = arith.addf %6, %8 : vector<8x128xf32>
    %10 = vector.extract_strided_slice %9 {offsets = [0, 0], sizes = [8, 96], strides = [1, 1]} : vector<8x128xf32> to vector<8x96xf32>
    %11 = arith.negf %10 : vector<8x96xf32>
    %12 = math.exp %11 : vector<8x96xf32>
    %cst_10 = arith.constant 1.000000e+00 : f32
    %13 = vector.broadcast %cst_10 : f32 to vector<8x96xf32>
    %14 = arith.addf %13, %12 : vector<8x96xf32>
    %15 = arith.divf %13, %14 : vector<8x96xf32>
    %16 = vector.extract_strided_slice %9 {offsets = [0, 96], sizes = [8, 32], strides = [1, 1]} : vector<8x128xf32> to vector<8x32xf32>
    %17 = math.tanh %16 : vector<8x32xf32>
    %18 = vector.extract_strided_slice %15 {offsets = [0, 0], sizes = [8, 32], strides = [1, 1]} : vector<8x96xf32> to vector<8x32xf32>
    %19 = vector.extract_strided_slice %15 {offsets = [0, 32], sizes = [8, 32], strides = [1, 1]} : vector<8x96xf32> to vector<8x32xf32>
    %20 = vector.extract_strided_slice %15 {offsets = [0, 64], sizes = [8, 32], strides = [1, 1]} : vector<8x96xf32> to vector<8x32xf32>
    %c0_11 = arith.constant 0 : index
    %c0_12 = arith.constant 0 : index
    %21 = vector.load %arg3[%c0_11, %c0_12] : memref<8x32xf32, #tpu.memory_space<vmem>>, vector<8x32xf32>
    %22 = arith.mulf %19, %21 : vector<8x32xf32>
    %23 = arith.mulf %18, %17 : vector<8x32xf32>
    %24 = arith.addf %22, %23 : vector<8x32xf32>
    %25 = math.tanh %24 : vector<8x32xf32>
    %26 = arith.mulf %20, %25 : vector<8x32xf32>
    %c0_13 = arith.constant 0 : index
    %c0_14 = arith.constant 0 : index
    %27 = vector.load %arg7[%c0_13, %c0_14] : memref<8x32xf32, #tpu.memory_space<vmem>>, vector<8x32xf32>
    tpu.vector_store %arg7[%c0_13, %c0_14], %26 {strides = array<i32>} : memref<8x32xf32, #tpu.memory_space<vmem>>, vector<8x32xf32>,
    %c0_15 = arith.constant 0 : index
    %c0_16 = arith.constant 0 : index
    %28 = vector.load %arg8[%c0_15, %c0_16] : memref<8x32xf32, #tpu.memory_space<vmem>>, vector<8x32xf32>
    tpu.vector_store %arg8[%c0_15, %c0_16], %24 {strides = array<i32>} : memref<8x32xf32, #tpu.memory_space<vmem>>, vector<8x32xf32>,
    return
  }
  func.func @transform_0(%arg0: i32) -> (i32, i32) {
    %c0_i32 = arith.constant 0 : i32
    %c0_i32_0 = arith.constant 0 : i32
    return %arg0, %c0_i32 : i32, i32
  }
  func.func @transform_1(%arg0: i32) -> (i32, i32) {
    %c0_i32 = arith.constant 0 : i32
    %c0_i32_0 = arith.constant 0 : i32
    return %arg0, %c0_i32 : i32, i32
  }
  func.func @transform_2(%arg0: i32) -> (i32, i32) {
    %c0_i32 = arith.constant 0 : i32
    %c0_i32_0 = arith.constant 0 : i32
    return %arg0, %c0_i32 : i32, i32
  }
  func.func @transform_3(%arg0: i32) -> (i32, i32) {
    %c0_i32 = arith.constant 0 : i32
    %c0_i32_0 = arith.constant 0 : i32
    %c0_i32_1 = arith.constant 0 : i32
    return %c0_i32, %c0_i32_0 : i32, i32
  }
  func.func @transform_4(%arg0: i32) -> (i32, i32) {
    %c0_i32 = arith.constant 0 : i32
    %c0_i32_0 = arith.constant 0 : i32
    %c0_i32_1 = arith.constant 0 : i32
    return %c0_i32, %c0_i32_0 : i32, i32
  }
  func.func @transform_5(%arg0: i32) -> (i32, i32) {
    %c0_i32 = arith.constant 0 : i32
    %c0_i32_0 = arith.constant 0 : i32
    %c0_i32_1 = arith.constant 0 : i32
    return %c0_i32, %c0_i32_0 : i32, i32
  }
  func.func @transform_6(%arg0: i32) -> (i32, i32) {
    %c0_i32 = arith.constant 0 : i32
    %c0_i32_0 = arith.constant 0 : i32
    return %arg0, %c0_i32 : i32, i32
  }
  func.func @transform_7(%arg0: i32) -> (i32, i32) {
    %c0_i32 = arith.constant 0 : i32
    %c0_i32_0 = arith.constant 0 : i32
    return %arg0, %c0_i32 : i32, i32
  }
}

</mosaic_0001>

<bundles_post_ra>
// kernel: xlstm_cell_forward.1
= control target key start
LH: loop header
LB: loop body
LE: loop exit
PB: predicated region body
PF: predicated region fallthrough
CT: control target
= control target key end

     0   :  { %13 = vsyncpa [#allocation3], 0  ;;  %s532_s0 = inlined_call_operand.hbm [shape: f32[8,16], index: 0, kind: input, shape index: {}]   ;;  %s533_s1 = inlined_call_operand.hbm [shape: f32[8,32], index: 1, kind: input, shape index: {}]   ;;  %s534_s2 = inlined_call_operand.hbm [shape: f32[8,32], index: 2, kind: input, shape index: {}]   ;;  %s535_s3 = inlined_call_operand.hbm [shape: f32[16,128], index: 3, kind: input, shape index: {}]   ;;  %s536_s4 = inlined_call_operand.hbm [shape: f32[32,128], index: 4, kind: input, shape index: {}]   ;;  %s537_s5 = inlined_call_operand.vmem [shape: f32[1,128], index: 5, kind: input, shape index: {}]   ;;  %s538_s6 = inlined_call_operand.hbm [shape: f32[8,32], index: 6, kind: output, shape index: {0}]   ;;  %s539_s7 = inlined_call_operand.hbm [shape: f32[8,32], index: 7, kind: output, shape index: {1}]  }
   0x1   :  { %14 = vsyncpa [#allocation6], 0 }
   0x2   :  { %15 = vsyncpa [#allocation9], 0 }
   0x3   :  { %16 = vsyncpa [#allocation4], 0  ;;  %s34_s26 = sshll.u32 %s533_s1, 4  ;;  %s35_s26 = int_to_ptr.hbm [resolvable:$true] %s34_s26 }
   0x4   :  { %17 = vsyncpa [#allocation13], 0  ;;  %s449_s27 = smov [#allocation5]   ;;  %s55_s8 = sshll.u32 %s535_s3, 4  ;;  %s56_s8 = int_to_ptr.hbm [resolvable:$true] %s55_s8 }
   0x5   :  { %s36_s28 = sshll.u32 %s449_s27, 4  ;;  %s450_s9 = smov [#allocation8]   ;;  %s37_s28 = int_to_ptr.vmem [resolvable:$true] %s36_s28 }
   0x6   :  { %39 = dma.hbm_to_vmem [thread:$0]  %s35_s26, 128, %s37_s28, [#allocation6]  }
   0x7   :  { %s57_s10 = sshll.u32 %s450_s9, 4  ;;  %s451_s11 = smov 128   ;;  %s58_s10 = int_to_ptr.vmem [resolvable:$true] %s57_s10 }
   0x8   :  { %s452_s12 = smov 8   ;;  %s23_s1 = sshll.u32 %s532_s0, 4  ;;  %s24_s1 = int_to_ptr.hbm [resolvable:$true] %s23_s1 }
   0x9   :  { %63 = dma.hbm_to_vmem [thread:$0]  %s56_s8, 256, %s58_s10, [#allocation9], %s451_s11, %s451_s11, %s452_s12  }
   0xa   :  { %s453_s15 = smov [#allocation2]   ;;  %s45_s3 = sshll.u32 %s534_s2, 4  ;;  %s46_s3 = int_to_ptr.hbm [resolvable:$true] %s45_s3 }
   0xb   :  { %s25_s16 = sshll.u32 %s453_s15, 4  ;;  %s454_s19 = smov [#allocation7]   ;;  %s26_s16 = int_to_ptr.vmem [resolvable:$true] %s25_s16 }
   0xc   :  { %28 = dma.hbm_to_vmem [thread:$0]  %s24_s1, 128, %s26_s16, [#allocation3]  }
   0xd   :  { %s47_s20 = sshll.u32 %s454_s19, 4  ;;  %s68_s23 = sshll.u32 %s536_s4, 4  ;;  %s48_s20 = int_to_ptr.vmem [resolvable:$true] %s47_s20  ;;  %s69_s23 = int_to_ptr.hbm [resolvable:$true] %s68_s23 }
   0xe   :  { %50 = dma.hbm_to_vmem [thread:$0]  %s46_s3, 128, %s48_s20, [#allocation6]  }
   0xf   :  { %s455_s0 = smov [#allocation10]  }
  0x10   :  { %s70_s24 = sshll.u32 %s455_s0, 4  ;;  %s71_s24 = int_to_ptr.vmem [resolvable:$true] %s70_s24 }
  0x11   :  { %76 = dma.hbm_to_vmem [thread:$0]  %s69_s23, 512, %s71_s24, [#allocation9], %s451_s11, %s451_s11, %s452_s12  }
  0x12   :  { %439 = dma.done.wait [#allocation3], 128  }
  0x13   :  { %440 = vsyncadd [#allocation3], 4294967168 }
  0x14   :  { %441 = dma.done.wait [#allocation6], 256  }
  0x15   :  { %442 = vsyncadd [#allocation6], 4294967040 }
  0x16   :  { %443 = dma.done.wait [#allocation9], 768  }
  0x17   :  { %444 = vsyncadd [#allocation9], 4294966528  ;;  %v106_v0 = vld [vmem:[#allocation10 + $0x18] sm:$0xff]  ;;  %v105_v1 = vld [vmem:[#allocation10 + $0x10] sm:$0xff]  ;;  %vm131_vm0 = vcmask 130048   ;;  %vm107_vm1 = vcmask 261120  }
  0x18   :  { %123 = vmatpush.msra.mxu0 %v106_v0  ;;  %v101_v2 = vld [vmem:[#allocation8 + $0x8] sm:$0xff]  ;;  %v100_v3 = vld [vmem:[#allocation8] sm:$0xff]  ;;  %v104_v4 = vld [vmem:[#allocation10 + $0x8] sm:$0xff]  ;;  %s456_s25 = smov 32   ;;  %s458_s26 = smov 96  }
  0x19   :  { %149 = vmatpush.msra.mxu1 %v101_v2  ;;  %v99_v5 = vld [vmem:[#allocation2] sm:$0xff]  ;;  %v103_v6 = vld [vmem:[#allocation10] sm:$0xff]  ;;  %v180_v14 = vld [vmem:[#allocation7] sm:$0xff]  ;;  %s459_s27 = smov [#allocation11]   ;;  %s219_s8 = sshll.u32 %s538_s6, 4  ;;  %s220_s8 = int_to_ptr.hbm [resolvable:$true] %s219_s8 }
  0x1a   :  { %124 = vmatpush.msra.mxu0 %v105_v1  ;;  %v102_v7 = vld [vmem:[#allocation5] sm:$0xff]  ;;  %v262_v9 = vld [vmem:[%s537_s5] ss:$0 sm:$0xff]  ;;  %s457_s5 = smov 64   ;;  %s217_s28 = sshll.u32 %s459_s27, 4  ;;  %s218_s28 = int_to_ptr.vmem [resolvable:$true] %s217_s28 }
  0x1b   :  { %150 = vmatpush.msra.mxu1 %v100_v3  ;;  %s460_s9 = smov [#allocation12]   ;;  %s230_s13 = sshll.u32 %s539_s7, 4  ;;  %s231_s13 = int_to_ptr.hbm [resolvable:$true] %s230_s13 }
  0x1c   :  { %125 = vmatpush.msra.mxu0 %v104_v4  ;;  %248 = vmatmul.msk.f32.vlgmr.msra.gmra.mxu1 %vm131_vm0, %v99_v5  ;;  %s228_s10 = sshll.u32 %s460_s9, 4  ;;  %s229_s10 = int_to_ptr.vmem [resolvable:$true] %s228_s10 }
  0x1e   :  { %126 = vmatpush.msra.mxu0 %v103_v6 }
  0x1f   :  { %247 = vmatmul.msk.f32.vlgmr.msra.gmra.mxu0 %vm107_vm1, %v102_v7 }
  0x99   :  { %v152_v8 = vpop.f32.mrf.mxu1 }
  0x9c   :  { %v128_v10 = vpop.f32.mrf.mxu0 }
  0x9d   :  { %v153_v11 = vadd.f32 %v152_v8, %v128_v10 }
  0x9f   :  { %v159_v12 = vadd.f32 %v262_v9, %v153_v11 }
  0xa1   :  { %263 = vtanh.f32 %v159_v12  ;;  %v249_v15 = vmul.f32 -1.442695, %v159_v12 }
  0xa3   :  { %265 = vpow2.f32 %v249_v15 }
  0xa7   :  { %v264_v13 = vpop.eup %263 }
  0xa8   :  { %187 = vrot.lane.b32.xlu0 %v264_v13, %s456_s25 }
  0xa9   :  { %v266_v16 = vpop.eup %265 }
  0xaa   :  { %v163_v17 = vadd.f32 1.0, %v266_v16 }
  0xac   :  { %267 = vrcp.f32 %v163_v17  ;;  %v175_v23 = vand.u32 2147483648, %v163_v17  ;;  %vm169_vm3 = vweird.f32 %v163_v17  ;;  %v173_v24 = vand.u32 2147483647, %v163_v17 }
  0xae   :  { %v176_v26 = vor.u32 1.1754944e-38, %v175_v23  ;;  %vm174_vm5 = vcmp.eq.f32.partialorder %v173_v24, 8.507059e+37 }
  0xb0   :  { %182 = vrot.lane.b32.xlu0 %v180_v14, %s456_s25 }
  0xb2   :  { %v268_v18 = vpop.eup %267 }
  0xb3   :  { %v165_v19 = vmul.f32 %v268_v18, %v163_v17  ;;  %vm170_vm2 = vweird.f32 %v268_v18 }
  0xb4   :  { %vm171_vm4 = vmor %vm169_vm3, %vm170_vm2 }
  0xb5   :  { %v166_v20 = vsub.f32 1.0, %v165_v19 }
  0xb7   :  { %v167_v21 = vmul.f32 %v268_v18, %v166_v20 }
  0xb9   :  { %v168_v22 = vadd.f32 %v268_v18, %v167_v21 }
  0xbb   :  { %v172_v25 = vsel %vm171_vm4, %v268_v18, %v168_v22 }
  0xbc   :  { %v177_v28 = vsel %vm174_vm5, %v176_v26, %v172_v25 }
 0x11a   :  { %v188_v27 = vpop.permute.xlu0 %187 }
 0x11b   :  { %v190_v29 = vmul.f32 %v188_v27, %v177_v28 }
 0x11d   :  { %192 = vrot.lane.b32.xlu1 %v190_v29, %s456_s25 }
 0x122   :  { %v183_v30 = vpop.permute.xlu0 %182 }
 0x123   :  { %v185_v31 = vmul.f32 %v183_v30, %v177_v28 }
 0x18f   :  { %v193_v32 = vpop.permute.xlu1 %192 }
 0x190   :  { %v195_v33 = vadd.f32 %v193_v32, %v185_v31 }
 0x192   :  { %269 = vtanh.f32 %v195_v33 }
 0x198   :  { %v270_v34 = vpop.eup %269 }
 0x199   :  { %198 = vrot.lane.b32.xlu1 %v270_v34, %s456_s25 }
 0x20b   :  { %v199_v35 = vpop.permute.xlu1 %198 }
 0x20c   :  { %v201_v36 = vmul.f32 %v199_v35, %v177_v28 }
 0x20e   :  { %203 = vrot.lane.b32.xlu2 %v201_v36, %s457_s5 }
 0x216   :  { %208 = vrot.lane.b32.xlu2 %v195_v33, %s458_s26 }
 0x268   :  { %v204_v37 = vpop.permute.xlu2 %203 }
 0x269   :  { %206 = vst.msk [vmem:[#allocation11] sm:$0xff] %vm107_vm1, %v204_v37 }
 0x26a   :  { %222 = dma.vmem_to_hbm [thread:$0]  %s218_s28, 128, %s220_s8, [#allocation4]  }
 0x270   :  { %v209_v38 = vpop.permute.xlu2 %208 }
 0x271   :  { %211 = vst.msk [vmem:[#allocation12] sm:$0xff] %vm107_vm1, %v209_v38 }
 0x272   :  { %233 = dma.vmem_to_hbm [thread:$0]  %s229_s10, 128, %s231_s13, [#allocation13]  }
 0x273   :  { %445 = dma.done.wait [#allocation4], 128  }
 0x274   :  { %446 = vsyncadd [#allocation4], 4294967168 }
 0x275   :  { %447 = dma.done.wait [#allocation13], 128  }
 0x276   :  { %448 = vsyncadd [#allocation13], 4294967168 }
 0x277   :  { %242 = vsyncpa [#allocation3], 1 }
 0x278   :  { %243 = vsyncpa [#allocation6], 1 }
 0x279   :  { %244 = vsyncpa [#allocation9], 1 }
 0x27a   :  { %245 = vsyncpa [#allocation4], 1 }
 0x27b   :  { %246 = vsyncpa [#allocation13], 1 }

</bundles_post_ra>
